<compile_context>
chip_gen: v5e
topology: v5e:2x2
jax: 0.10.0
libtpu: 0.0.40
codegen_flags: <defaults>
</compile_context>

<pallas_src>
import functools

import jax
import jax.numpy as jnp
from jax import lax
from jax.experimental import pallas as pl
from jax.experimental.pallas import tpu as pltpu


def _rope_kernel_full(inv_freq_ref, cos_ref, sin_ref, *, tile_s, dim):
    # inv_freq_ref: (1, dim)  (already cat(inv_freq, inv_freq))
    # cos_ref/sin_ref: (tile_s, dim)
    row = pl.program_id(0) * tile_s + lax.broadcasted_iota(
        jnp.int32, (tile_s, dim), 0)
    t = row.astype(jnp.float32)
    w = jnp.broadcast_to(inv_freq_ref[...], (tile_s, dim))
    emb = t * w
    cos_ref[...] = jnp.cos(emb).astype(cos_ref.dtype)
    sin_ref[...] = jnp.sin(emb).astype(sin_ref.dtype)


def _rope_kernel_half(inv_freq_ref, cos_ref, sin_ref, *, tile_s, dim):
    # Duplicate-aware path (dim % 256 == 0 -> half is a multiple of 128 lanes).
    # inv_freq_ref: (1, dim//2); cos_ref/sin_ref: (tile_s, dim)
    half = dim // 2
    row = pl.program_id(0) * tile_s + lax.broadcasted_iota(
        jnp.int32, (tile_s, half), 0)
    t = row.astype(jnp.float32)
    w = jnp.broadcast_to(inv_freq_ref[...], (tile_s, half))
    freqs = t * w
    c = jnp.cos(freqs).astype(cos_ref.dtype)
    s = jnp.sin(freqs).astype(sin_ref.dtype)
    cos_ref[:, :half] = c
    cos_ref[:, half:] = c
    sin_ref[:, :half] = s
    sin_ref[:, half:] = s


def rotary_positional_embedding(x, seq_len, dim, max_seq_len=2048,
                                out_dtype=jnp.float32):
    """Returns (cos, sin), each (seq_len, dim) in out_dtype (default float32).

    `x` only supplies device placement in the PyTorch module; it does not
    enter the computation. `max_seq_len` is unused (as in the reference).
    """
    del x, max_seq_len
    half = dim // 2
    inv_freq = 1.0 / (10000.0 ** (jnp.arange(0, dim, 2, dtype=jnp.float32) / dim))

    # Row tile: small enough to give multiple grid steps (megacore sharding on
    # v7x + compute/writeback overlap), big enough to amortize per-step
    # overhead.  (tile_s, dim) f32 x2 outputs double-buffered is well under
    # any scoped-VMEM limit; no vmem_limit_bytes tuning needed.
    tile_s = seq_len if seq_len <= 256 else 256
    grid = (pl.cdiv(seq_len, tile_s),)

    use_half = (dim % 256 == 0)
    if use_half:
        inv_in = inv_freq.reshape(1, half)
        kernel = functools.partial(_rope_kernel_half, tile_s=tile_s, dim=dim)
        transcendentals = seq_len * dim            # cos+sin on half width
    else:
        inv_in = jnp.concatenate([inv_freq, inv_freq], axis=0).reshape(1, dim)
        kernel = functools.partial(_rope_kernel_full, tile_s=tile_s, dim=dim)
        transcendentals = 2 * seq_len * dim
    in_width = inv_in.shape[1]
    out_itemsize = jnp.dtype(out_dtype).itemsize

    cos, sin = pl.pallas_call(
        kernel,
        out_shape=(jax.ShapeDtypeStruct((seq_len, dim), out_dtype),
                   jax.ShapeDtypeStruct((seq_len, dim), out_dtype)),
        grid=grid,
        in_specs=[pl.BlockSpec((1, in_width), lambda i: (0, 0))],
        out_specs=(pl.BlockSpec((tile_s, dim), lambda i: (i, 0)),
                   pl.BlockSpec((tile_s, dim), lambda i: (i, 0))),
        compiler_params=pltpu.CompilerParams(
            dimension_semantics=("parallel",)),
        cost_estimate=pl.CostEstimate(
            flops=2 * seq_len * dim,
            transcendentals=transcendentals,
            bytes_accessed=2 * seq_len * dim * out_itemsize + in_width * 4),
    )(inv_in)
    return cos, sin


def _reference(seq_len, dim):
    inv_freq = 1.0 / (10000.0 ** (jnp.arange(0, dim, 2, dtype=jnp.float32) / dim))
    t = jnp.arange(seq_len, dtype=jnp.float32)
    freqs = jnp.einsum("i,j->ij", t, inv_freq)
    emb = jnp.concatenate([freqs, freqs], axis=-1)
    return jnp.cos(emb), jnp.sin(emb)


if __name__ == "__main__":
    key = jax.random.PRNGKey(0)

    # Main small-shape test (matches the module's forward signature usage).
    batch, seq_len, dim = 2, 8, 32
    x = jax.random.normal(key, (batch, seq_len, dim), dtype=jnp.float32)
    cos, sin = rotary_positional_embedding(x, seq_len=seq_len, dim=dim)
    jax.block_until_ready((cos, sin))
    ref_c, ref_s = _reference(seq_len, dim)
    assert cos.shape == (seq_len, dim) and sin.shape == (seq_len, dim)
    assert jnp.allclose(cos, ref_c, atol=1e-5)
    assert jnp.allclose(sin, ref_s, atol=1e-5)

    # Exercise the multi-tile grid path (8 tiles of 256 rows).
    cos2, sin2 = rotary_positional_embedding(x, seq_len=2048, dim=64)
    jax.block_until_ready((cos2, sin2))
    ref_c2, ref_s2 = _reference(2048, 64)
    assert jnp.allclose(cos2, ref_c2, atol=1e-4, rtol=1e-5)
    assert jnp.allclose(sin2, ref_s2, atol=1e-4, rtol=1e-5)

    # Exercise the duplicate-aware (half-width compute) path for dim % 256 == 0.
    cos3, sin3 = rotary_positional_embedding(x, seq_len=512, dim=256)
    jax.block_until_ready((cos3, sin3))
    ref_c3, ref_s3 = _reference(512, 256)
    assert jnp.allclose(cos3, ref_c3, atol=1e-4, rtol=1e-5)
    assert jnp.allclose(sin3, ref_s3, atol=1e-4, rtol=1e-5)

    print("KERNEL_OK")
</pallas_src>

<mosaic_0001>
module attributes {stable_mosaic.version = 11 : i64} {
  func.func @_rope_kernel_full(%arg0: i32, %arg1: memref<1x32xf32, #tpu.memory_space<vmem>>, %arg2: memref<8x32xf32, #tpu.memory_space<vmem>>, %arg3: memref<8x32xf32, #tpu.memory_space<vmem>>) attributes {dimension_semantics = [#tpu.dimension_semantics<parallel>], iteration_bounds = array<i64: 1>, scalar_prefetch = 0 : i64, scratch_operands = 0 : i64, tpu.core_type = #tpu.core_type<tc>, window_params = [{pipeline_mode = #tpu.pipeline_mode<synchronous>, transform_indices = @transform_0, window_bounds = array<i64: 1, 32>}, {transform_indices = @transform_1, window_bounds = array<i64: 8, 32>}, {transform_indices = @transform_2, window_bounds = array<i64: 8, 32>}]} {
    %c8_i32 = arith.constant 8 : i32
    %0 = arith.muli %arg0, %c8_i32 : i32
    %1 = tpu.iota {dimensions = array<i32: 0>} : vector<8x32xi32>
    %2 = vector.broadcast %0 : i32 to vector<8x32xi32>
    %3 = arith.addi %2, %1 : vector<8x32xi32>
    %4 = arith.sitofp %3 : vector<8x32xi32> to vector<8x32xf32>
    %c0 = arith.constant 0 : index
    %c0_0 = arith.constant 0 : index
    %5 = vector.load %arg1[%c0, %c0_0] : memref<1x32xf32, #tpu.memory_space<vmem>>, vector<1x32xf32>
    %6 = vector.shape_cast %5 : vector<1x32xf32> to vector<1x32xf32>
    %7 = vector.broadcast %6 : vector<1x32xf32> to vector<8x32xf32>
    %8 = arith.mulf %4, %7 : vector<8x32xf32>
    %9 = math.cos %8 : vector<8x32xf32>
    %c0_1 = arith.constant 0 : index
    %c0_2 = arith.constant 0 : index
    %10 = vector.load %arg2[%c0_1, %c0_2] : memref<8x32xf32, #tpu.memory_space<vmem>>, vector<8x32xf32>
    tpu.vector_store %arg2[%c0_1, %c0_2], %9 {strides = array<i32>} : memref<8x32xf32, #tpu.memory_space<vmem>>, vector<8x32xf32>,
    %11 = math.sin %8 : vector<8x32xf32>
    %c0_3 = arith.constant 0 : index
    %c0_4 = arith.constant 0 : index
    %12 = vector.load %arg3[%c0_3, %c0_4] : memref<8x32xf32, #tpu.memory_space<vmem>>, vector<8x32xf32>
    tpu.vector_store %arg3[%c0_3, %c0_4], %11 {strides = array<i32>} : memref<8x32xf32, #tpu.memory_space<vmem>>, vector<8x32xf32>,
    return
  }
  func.func @transform_0(%arg0: i32) -> (i32, i32) {
    %c0_i32 = arith.constant 0 : i32
    %c0_i32_0 = arith.constant 0 : i32
    %c0_i32_1 = arith.constant 0 : i32
    return %c0_i32, %c0_i32_0 : i32, i32
  }
  func.func @transform_1(%arg0: i32) -> (i32, i32) {
    %c0_i32 = arith.constant 0 : i32
    %c0_i32_0 = arith.constant 0 : i32
    return %arg0, %c0_i32 : i32, i32
  }
  func.func @transform_2(%arg0: i32) -> (i32, i32) {
    %c0_i32 = arith.constant 0 : i32
    %c0_i32_0 = arith.constant 0 : i32
    return %arg0, %c0_i32 : i32, i32
  }
}

</mosaic_0001>

<bundles_post_ra>
// kernel: tpu_custom_call.1
= control target key start
LH: loop header
LB: loop body
LE: loop exit
PB: predicated region body
PF: predicated region fallthrough
CT: control target
= control target key end

     0   :  { %8 = vsyncpa [#allocation3], 0  ;;  %s558_s0 = inlined_call_operand.hbm [shape: f32[1,32], index: 0, kind: input, shape index: {}]   ;;  %s559_s1 = inlined_call_operand.hbm [shape: f32[8,32], index: 1, kind: output, shape index: {0}]   ;;  %s560_s2 = inlined_call_operand.hbm [shape: f32[8,32], index: 2, kind: output, shape index: {1}]  }
   0x1   :  { %9 = vsyncpa [#allocation4], 0 }
   0x2   :  { %10 = vsyncpa [#allocation7], 0  ;;  %s16_s11 = sshll.u32 %s558_s0, 4  ;;  %s477_s12 = smov [#allocation2]   ;;  %s17_s11 = int_to_ptr.hbm [resolvable:$true] %s16_s11 }
   0x3   :  { %s18_s13 = sshll.u32 %s477_s12, 4  ;;  %s19_s13 = int_to_ptr.vmem [resolvable:$true] %s18_s13 }
   0x4   :  { %21 = dma.hbm_to_vmem [thread:$0]  %s17_s11, 16, %s19_s13, [#allocation3]  }
   0x5   :  { %471 = dma.done.wait [#allocation3], 16  }
   0x6   :  { %472 = vsyncadd [#allocation3], 4294967280  ;;  %v27_v0 = vlaneseq  ;;  %v398_v3 = vld [vmem:[#allocation2] ss:$0 sm:$0xff]  ;;  %v478_v16 = vmov 683565275  }
   0x7   :  { %v479_v18 = vmov 2475754826   ;;  %v480_v20 = vmov 2131351028   ;;  %v481_v22 = vmov 2102212464  }
   0x8   :  { %v28_v1 = vshrl.u32 %v27_v0, 7  ;;  %v482_v24 = vmov 920167782   ;;  %v483_v30 = vmov 1326507024   ;;  %s485_s0 = smov [#allocation5]  }
   0x9   :  { %s354_s14 = sshll.u32 %s485_s0, 4  ;;  %s356_s17 = sshll.u32 %s559_s1, 4  ;;  %s355_s14 = int_to_ptr.vmem [resolvable:$true] %s354_s14  ;;  %s357_s17 = int_to_ptr.hbm [resolvable:$true] %s356_s17 }
   0xa   :  { %v31_v2 = vcvt.s32.f32 %v28_v1  ;;  %s486_s18 = smov [#allocation6]   ;;  %s367_s22 = sshll.u32 %s560_s2, 4  ;;  %s368_s22 = int_to_ptr.hbm [resolvable:$true] %s367_s22 }
   0xb   :  { %s365_s19 = sshll.u32 %s486_s18, 4  ;;  %s366_s19 = int_to_ptr.vmem [resolvable:$true] %s365_s19 }
   0xc   :  { %v505_v4 = vmul.f32 %v398_v3, %v31_v2 }
   0xe   :  { %v40_v5 = vand.u32 2139095040, %v505_v4  ;;  %v37_v7 = vand.u32 2147483647, %v505_v4  ;;  %vm39_vm12 = vcmp.lt.s32.totalorder %v505_v4, 0 }
  0x10   :  { %v41_v6 = vshrl.u32 %v40_v5, 23  ;;  %v44_v10 = vand.u32 8388607, %v37_v7  ;;  %v484_v5 = vmov 0   ;;  %vm38_vm13 = vcmp.le.f32.partialorder %v37_v7, 0.7853982 }
  0x12   :  { %v382_v8 = vadd.s32 4294967169, %v41_v6  ;;  %v45_v13 = vor.u32 8388608, %v44_v10 }
  0x14   :  { %v47_v9 = vadd.s32 1, %v382_v8  ;;  %v514_v32 = vshll.u32 %v45_v13, 8 }
  0x16   :  { %vm48_vm0 = vcmp.gt.s32.totalorder %v47_v9, 0  ;;  %v86_v44 = vand.u32 65535, %v514_v32  ;;  %v87_v45 = vshrl.u32 %v514_v32, 16 }
  0x17   :  { %v49_v11 = vsel %vm48_vm0, %v47_v9, 0 }
  0x18   :  { %v51_v12 = vand.u32 31, %v49_v11  ;;  %v511_v14 = vshrl.u32 %v49_v11, 5 }
  0x1a   :  { %v52_v15 = vsub.s32 32, %v51_v12  ;;  %v54_v17 = vshll.u32 %v478_v16, %v51_v12  ;;  %v57_v19 = vshll.u32 %v479_v18, %v51_v12  ;;  %v60_v21 = vshll.u32 %v480_v20, %v51_v12 }
  0x1b   :  { %v63_v23 = vshll.u32 %v481_v22, %v51_v12  ;;  %v66_v25 = vshll.u32 %v482_v24, %v51_v12  ;;  %vm69_vm1 = vcmp.lt.s32.totalorder %v511_v14, 1  ;;  %vm72_vm2 = vcmp.lt.s32.totalorder %v511_v14, 4 }
  0x1c   :  { %v55_v26 = vshrl.u32 %v479_v18, %v52_v15  ;;  %v58_v27 = vshrl.u32 %v480_v20, %v52_v15  ;;  %v61_v28 = vshrl.u32 %v481_v22, %v52_v15  ;;  %v64_v29 = vshrl.u32 %v482_v24, %v52_v15 }
  0x1d   :  { %v67_v31 = vshrl.u32 %v483_v30, %v52_v15  ;;  %vm71_vm3 = vcmp.lt.s32.totalorder %v511_v14, 3  ;;  %vm70_vm4 = vcmp.lt.s32.totalorder %v511_v14, 2  ;;  %v53_v52 = vshrl.u32 %v478_v16, %v52_v15 }
  0x1e   :  { %v56_v33 = vor.u32 %v55_v26, %v54_v17  ;;  %v59_v34 = vor.u32 %v58_v27, %v57_v19  ;;  %v62_v35 = vor.u32 %v61_v28, %v60_v21  ;;  %v65_v36 = vor.u32 %v64_v29, %v63_v23 }
  0x1f   :  { %v68_v37 = vor.u32 %v67_v31, %v66_v25 }
  0x20   :  { %v77_v38 = vsel %vm69_vm1, %v56_v33, %v59_v34  ;;  %v81_v39 = vsel %vm69_vm1, %v59_v34, %v62_v35  ;;  %v78_v40 = vsel %vm72_vm2, %v65_v36, 920167782  ;;  %v73_v1 = vsel %vm69_vm1, %v53_v52, %v56_v33 }
  0x21   :  { %v82_v41 = vsel %vm72_vm2, %v68_v37, 1326507024  ;;  %v79_v42 = vsel %vm71_vm3, %v62_v35, %v78_v40  ;;  %v74_v3 = vsel %vm72_vm2, %v62_v35, 2102212464 }
  0x22   :  { %v83_v43 = vsel %vm71_vm3, %v65_v36, %v82_v41  ;;  %v80_v46 = vsel %vm70_vm4, %v77_v38, %v79_v42  ;;  %v75_v16 = vsel %vm71_vm3, %v59_v34, %v74_v3 }
  0x23   :  { %v84_v47 = vsel %vm70_vm4, %v81_v39, %v83_v43  ;;  %v110_v50 = vand.u32 65535, %v80_v46  ;;  %v111_v51 = vshrl.u32 %v80_v46, 16  ;;  %v76_v24 = vsel %vm70_vm4, %v73_v1, %v75_v16 }
  0x24   :  { %v88_v48 = vand.u32 65535, %v84_v47  ;;  %v89_v49 = vshrl.u32 %v84_v47, 16  ;;  %v130_v28 = vmul.u32 %v514_v32, %v76_v24  ;;  %vm180_vm4 = vweird.f32 %v505_v4 }
  0x25   :  { %v112_v56 = vmul.u32 %v110_v50, %v86_v44  ;;  %v113_v57 = vmul.u32 %v111_v51, %v86_v44  ;;  %v114_v58 = vmul.u32 %v110_v50, %v87_v45  ;;  %v115_v62 = vmul.u32 %v111_v51, %v87_v45 }
  0x26   :  { %v90_v53 = vmul.u32 %v88_v48, %v86_v44  ;;  %v91_v54 = vmul.u32 %v89_v49, %v86_v44  ;;  %v92_v55 = vmul.u32 %v88_v48, %v87_v45  ;;  %v93_v59 = vmul.u32 %v89_v49, %v87_v45 }
  0x27   :  { %v116_v63 = vshll.u32 %v113_v57, 16  ;;  %v118_v0 = vshll.u32 %v114_v58, 16  ;;  %v117_v13 = vshrl.u32 %v113_v57, 16  ;;  %v119_v20 = vshrl.u32 %v114_v58, 16 }
  0x28   :  { %v94_v60 = vshll.u32 %v91_v54, 16  ;;  %v96_v61 = vshll.u32 %v92_v55, 16  ;;  %v95_v9 = vshrl.u32 %v91_v54, 16  ;;  %v97_v17 = vshrl.u32 %v92_v55, 16 }
  0x29   :  { %vm120_vm6 = vc.u32 %v112_v56, %v116_v63  ;;  %v122_v8 = vadd.s32 %v116_v63, %v112_v56 }
  0x2a   :  { %vm98_vm5 = vc.u32 %v90_v53, %v94_v60  ;;  %v100_v2 = vadd.s32 %v94_v60, %v90_v53  ;;  %v121_v11 = vsel %vm120_vm6, 1, %v484_v5 }
  0x2b   :  { %v99_v6 = vsel %vm98_vm5, 1, %v484_v5  ;;  %v123_v15 = vadd.s32 %v121_v11, %v115_v62  ;;  %vm124_vm8 = vc.u32 %v122_v8, %v118_v0  ;;  %v126_v23 = vadd.s32 %v122_v8, %v118_v0 }
  0x2c   :  { %v101_v10 = vadd.s32 %v99_v6, %v93_v59  ;;  %vm102_vm7 = vc.u32 %v100_v2, %v96_v61  ;;  %v125_v19 = vsel %vm124_vm8, 1, %v484_v5  ;;  %vm191_vm5 = vcmask 261120  }
  0x2d   :  { %v103_v12 = vsel %vm102_vm7, 1, %v484_v5  ;;  %v127_v21 = vadd.s32 %v125_v19, %v123_v15 }
  0x2e   :  { %v105_v18 = vadd.s32 %v103_v12, %v101_v10 }
  0x2f   :  { %v128_v25 = vadd.s32 %v127_v21, %v117_v13 }
  0x30   :  { %v106_v22 = vadd.s32 %v105_v18, %v95_v9 }
  0x31   :  { %v129_v27 = vadd.s32 %v128_v25, %v119_v20 }
  0x32   :  { %v107_v26 = vadd.s32 %v106_v22, %v97_v17 }
  0x33   :  { %v133_v29 = vadd.s32 1, %v129_v27 }
  0x34   :  { %vm132_vm9 = vc.u32 %v107_v26, %v126_v23  ;;  %v131_v14 = vadd.s32 %v126_v23, %v107_v26 }
  0x35   :  { %v134_v30 = vsel %vm132_vm9, %v133_v29, %v129_v27 }
  0x36   :  { %v135_v31 = vadd.s32 %v134_v30, %v130_v28 }
  0x38   :  { %v136_v33 = vadd.s32 536870912, %v135_v31 }
  0x3a   :  { %v137_v34 = vshrl.u32 %v136_v33, 30 }
  0x3c   :  { %v138_v35 = vshll.u32 %v137_v34, 30  ;;  %v161_v52 = vsub.s32 4, %v137_v34 }
  0x3e   :  { %v139_v36 = vsub.s32 %v135_v31, %v138_v35  ;;  %v162_v55 = vsel %vm39_vm12, %v161_v52, %v137_v34 }
  0x3f   :  { %v164_v58 = vsel %vm38_vm13, 0, %v162_v55 }
  0x40   :  { %vm140_vm10 = vcmp.lt.s32.totalorder %v139_v36, 0  ;;  %v141_v37 = vsub.s32 0, %v139_v36  ;;  %v337_v63 = vadd.s32 3, %v164_v58  ;;  %v181_v5 = vand.u32 3, %v164_v58 }
  0x42   :  { %v142_v38 = vsel %vm140_vm10, %v141_v37, %v139_v36  ;;  %v338_v6 = vand.u32 3, %v337_v63  ;;  %vm186_vm14 = vcmp.eq.s32.totalorder %v181_v5, 2  ;;  %vm182_vm0 = vcmp.lt.s32.totalorder %v181_v5, 2 }
  0x43   :  { %v143_v39 = vclz %v142_v38  ;;  %vm183_vm1 = vcmp.eq.s32.totalorder %v181_v5, 0 }
  0x44   :  { %vm343_vm15 = vcmp.eq.s32.totalorder %v338_v6, 2  ;;  %vm340_vm2 = vcmp.eq.s32.totalorder %v338_v6, 0  ;;  %vm339_vm3 = vcmp.lt.s32.totalorder %v338_v6, 2 }
  0x45   :  { %v383_v40 = vadd.s32 4294967294, %v143_v39 }
  0x47   :  { %vm384_vm11 = vcmp.lt.s32.totalorder %v383_v40, 0 }
  0x48   :  { %v146_v41 = vsel %vm384_vm11, 0, %v383_v40 }
  0x49   :  { %v147_v42 = vsub.s32 32, %v146_v41  ;;  %v148_v43 = vshll.u32 %v139_v36, %v146_v41  ;;  %v151_v44 = vsub.s32 4294967266, %v146_v41 }
  0x4b   :  { %v149_v32 = vshrl.u32 %v131_v14, %v147_v42  ;;  %v152_v45 = vadd.s32 127, %v151_v44 }
  0x4d   :  { %v150_v46 = vor.u32 %v149_v32, %v148_v43  ;;  %v153_v47 = vshll.u32 %v152_v45, 23 }
  0x4f   :  { %v154_v48 = vor.u32 4788187, %v153_v47  ;;  %v157_v49 = vcvt.s32.f32 %v150_v46 }
  0x51   :  { %v155_v50 = vand.u32 2147483647, %v154_v48 }
  0x53   :  { %v158_v51 = vmul.f32 %v157_v49, %v155_v50 }
  0x55   :  { %v159_v53 = vxor.u32 2147483648, %v158_v51 }
  0x57   :  { %v160_v54 = vsel %vm39_vm12, %v159_v53, %v158_v51 }
  0x58   :  { %v163_v56 = vsel %vm38_vm13, %v505_v4, %v160_v54 }
  0x59   :  { %v165_v57 = vmul.f32 %v163_v56, %v163_v56 }
  0x5b   :  { %v166_v59 = vmul.f32 -0.001358992, %v165_v57  ;;  %v173_v60 = vmul.f32 -0.00019511016, %v165_v57 }
  0x5d   :  { %v167_v61 = vadd.f32 0.041655596, %v166_v59  ;;  %v174_v62 = vadd.f32 0.008332121, %v173_v60 }
  0x5f   :  { %v168_v0 = vmul.f32 %v167_v61, %v165_v57  ;;  %v175_v1 = vmul.f32 %v174_v62, %v165_v57 }
  0x61   :  { %v169_v2 = vadd.f32 -0.4999988, %v168_v0  ;;  %v176_v3 = vadd.f32 -0.16666654, %v175_v1 }
  0x63   :  { %v170_v8 = vmul.f32 %v169_v2, %v165_v57  ;;  %v177_v7 = vmul.f32 %v176_v3, %v165_v57 }
  0x65   :  { %v171_v9 = vadd.f32 1.0, %v170_v8  ;;  %v178_v10 = vadd.f32 1.0, %v177_v7 }
  0x67   :  { %v179_v11 = vmul.f32 %v178_v10, %v163_v56  ;;  %v187_v12 = vxor.u32 2147483648, %v171_v9 }
  0x69   :  { %v184_v13 = vxor.u32 2147483648, %v179_v11  ;;  %v188_v15 = vsel %vm186_vm14, %v187_v12, %v179_v11  ;;  %v345_v16 = vsel %vm343_vm15, %v187_v12, %v179_v11 }
  0x6b   :  { %v185_v17 = vsel %vm183_vm1, %v171_v9, %v184_v13  ;;  %v342_v18 = vsel %vm340_vm2, %v171_v9, %v184_v13 }
  0x6c   :  { %v189_v19 = vsel %vm182_vm0, %v185_v17, %v188_v15  ;;  %v346_v20 = vsel %vm339_vm3, %v342_v18, %v345_v16 }
  0x6d   :  { %v190_v21 = vsel %vm180_vm4, nan, %v189_v19  ;;  %v347_v22 = vsel %vm180_vm4, nan, %v346_v20 }
  0x6e   :  { %192 = vst.msk [vmem:[#allocation5] sm:$0xff] %vm191_vm5, %v190_v21 }
  0x6f   :  { %348 = vst.msk [vmem:[#allocation6] sm:$0xff] %vm191_vm5, %v347_v22  ;;  %359 = dma.vmem_to_hbm [thread:$0]  %s355_s14, 128, %s357_s17, [#allocation4]  }
  0x70   :  { %370 = dma.vmem_to_hbm [thread:$0]  %s366_s19, 128, %s368_s22, [#allocation7]  }
  0x71   :  { %473 = dma.done.wait [#allocation4], 128  }
  0x72   :  { %474 = vsyncadd [#allocation4], 4294967168 }
  0x73   :  { %475 = dma.done.wait [#allocation7], 128  }
  0x74   :  { %476 = vsyncadd [#allocation7], 4294967168 }
  0x75   :  { %379 = vsyncpa [#allocation3], 1 }
  0x76   :  { %380 = vsyncpa [#allocation4], 1 }
  0x77   :  { %381 = vsyncpa [#allocation7], 1 }

</bundles_post_ra>
